<compile_context>
chip_gen: v7x
topology: tpu7x:2x2x1
jax: 0.10.0
libtpu: 0.0.40
codegen_flags: <defaults>
</compile_context>

<pallas_src>
import jax
import jax.numpy as jnp
from jax.experimental import pallas as pl
from jax.experimental.pallas import tpu as pltpu


def _round_up(x, m):
    return (x + m - 1) // m * m


def _conv_bn_silu_kernel(p_ref, w_ref, b_ref, o_ref):
    # One (batch, spatial-tile) grid step.
    #   p_ref: (1, K, TS)    bf16  space-to-depth patches (channel-major)
    #   w_ref: (Cout, K)     bf16  conv weights with BN scale folded in (resident)
    #   b_ref: (Cout, 1)     f32   folded BN bias (resident)
    #   o_ref: (1, Cout, TS)       output, already in NCHW-flat layout
    acc = jnp.dot(w_ref[...], p_ref[0], preferred_element_type=jnp.float32)
    y = acc + b_ref[...]                                   # f32 epilogue
    # SiLU = y * sigmoid(y); exp and the approximate reciprocal both land on
    # the EUP slot instead of a full-precision VALU divide.
    e = jnp.exp(-y)
    o_ref[0] = (y * pl.reciprocal(1.0 + e, approx=True)).astype(o_ref.dtype)


def _pick_spatial_tile(S, K, Cout, out_bytes):
    """Largest lane-dense spatial tile that divides S and fits VMEM comfortably."""
    budget = 32 << 20  # double-buffered input + output tile budget

    def fits(ts):
        return 2 * ts * (K * 2 + Cout * out_bytes) <= budget

    for ts in (2048, 1024, 512, 256, 128):
        if S % ts == 0 and fits(ts):
            return ts, False
    if S <= 4096 and fits(S):            # small / awkward S: single full-dim tile
        return S, False
    for ts in (2048, 1024, 512, 256, 128):
        if fits(ts):
            return ts, True              # needs S padding
    return 128, True


def downsample_x2(x_nchw, weight, gamma, beta, running_mean, running_var, eps=1e-5):
    """x_nchw: (B, Cin, H, W); weight: (Cout, Cin, 2, 2). Returns (B, Cout, H//2, W//2)."""
    B, Cin, H, W = x_nchw.shape
    Cout = weight.shape[0]
    assert weight.shape == (Cout, Cin, 2, 2), weight.shape
    # nn.Conv2d(k=2, s=2, p=0) floor-divides odd spatial dims: crop like PyTorch.
    OH, OW = H // 2, W // 2
    S = OH * OW
    K = Cin * 4
    out_dtype = x_nchw.dtype
    out_bytes = jnp.dtype(out_dtype).itemsize

    # --- glue: space-to-depth, channel-major, bf16 (one read-f32/write-bf16 pass) ---
    # p[b, ci*4 + kh*2 + kw, oh*OW + ow] = x[b, ci, 2*oh+kh, 2*ow+kw]
    xb = x_nchw[:, :, : 2 * OH, : 2 * OW].astype(jnp.bfloat16)
    p = xb.reshape(B, Cin, OH, 2, OW, 2).transpose(0, 1, 3, 5, 2, 4).reshape(B, K, S)

    # --- fold BatchNorm (eval mode): scale into the weights, keep only the bias ---
    scale = gamma / jnp.sqrt(running_var + eps)                         # (Cout,)
    bias = beta - running_mean * scale                                  # (Cout,)
    w_mat = (weight.reshape(Cout, K).astype(jnp.float32) * scale[:, None])
    w_mat = w_mat.astype(jnp.bfloat16)                                  # (Cout, K)
    bias_col = bias.reshape(Cout, 1).astype(jnp.float32)

    # --- spatial tiling: lane-dense output tiles, weights/bias stay resident ---
    TS, _ = _pick_spatial_tile(S, K, Cout, out_bytes)
    Spad = _round_up(S, TS)
    if Spad != S:
        p = jnp.pad(p, ((0, 0), (0, 0), (0, Spad - S)))
    num_s = Spad // TS
    # Keep >= 2 grid steps so the "parallel" axes can shard across both
    # TensorCores on v7x.
    if B * num_s < 2 and TS % 256 == 0:
        TS //= 2
        num_s = Spad // TS
    grid = (B, num_s)

    # per-step VMEM: double-buffered patch/out tiles + resident weights/bias,
    # with headroom but capped below physical VMEM (v7x has only 64 MiB/TC).
    vmem_est = 2 * (TS * K * 2 + TS * Cout * out_bytes) + Cout * K * 2 + Cout * 4
    vmem_limit = int(min(max(2 * vmem_est, 8 << 20), 48 << 20))

    cost = pl.CostEstimate(
        flops=2 * B * Cout * K * Spad,
        transcendentals=B * Cout * Spad,
        bytes_accessed=B * K * Spad * 2 + Cout * K * 2 + Cout * 4
        + B * Cout * Spad * out_bytes,
    )

    out_flat = pl.pallas_call(
        _conv_bn_silu_kernel,
        out_shape=jax.ShapeDtypeStruct((B, Cout, Spad), out_dtype),
        grid=grid,
        in_specs=[
            pl.BlockSpec((1, K, TS), lambda b, s: (b, 0, s)),   # patches: tiled
            pl.BlockSpec((Cout, K), lambda b, s: (0, 0)),       # weights: resident
            pl.BlockSpec((Cout, 1), lambda b, s: (0, 0)),       # bias:    resident
        ],
        out_specs=pl.BlockSpec((1, Cout, TS), lambda b, s: (b, 0, s)),
        compiler_params=pltpu.CompilerParams(
            dimension_semantics=("parallel", "parallel"),
            vmem_limit_bytes=vmem_limit,
        ),
        cost_estimate=cost,
    )(p, w_mat, bias_col)

    if Spad != S:
        out_flat = out_flat[:, :, :S]
    # (B, Cout, OH*OW) -> (B, Cout, OH, OW) is a pure reshape: no relayout,
    # no transpose, no padded-column readback.
    return out_flat.reshape(B, Cout, OH, OW)


def _reference(x, weight, gamma, beta, mean, var, eps=1e-5):
    # pure-JAX reference: conv(k=2,s=2,p=0,bias=False) + BN(eval) + SiLU, NCHW
    y = jax.lax.conv_general_dilated(
        x, weight, window_strides=(2, 2), padding="VALID",
        dimension_numbers=("NCHW", "OIHW", "NCHW"))
    s = gamma / jnp.sqrt(var + eps)
    y = y * s[None, :, None, None] + (beta - mean * s)[None, :, None, None]
    return y * jax.nn.sigmoid(y)


if __name__ == "__main__":
    key = jax.random.PRNGKey(0)
    k_x, k_w, k_g, k_b, k_m, k_v = jax.random.split(key, 6)

    B, Cin, H, W = 2, 4, 16, 16
    Cout = 8

    x = jax.random.normal(k_x, (B, Cin, H, W), dtype=jnp.float32)
    weight = jax.random.normal(k_w, (Cout, Cin, 2, 2), dtype=jnp.float32) * 0.1
    gamma = jax.random.normal(k_g, (Cout,), dtype=jnp.float32) * 0.1 + 1.0
    beta = jax.random.normal(k_b, (Cout,), dtype=jnp.float32) * 0.1
    running_mean = jax.random.normal(k_m, (Cout,), dtype=jnp.float32) * 0.1
    running_var = jnp.abs(jax.random.normal(k_v, (Cout,), dtype=jnp.float32)) * 0.1 + 1.0

    out = downsample_x2(x, weight, gamma, beta, running_mean, running_var)
    out = jax.block_until_ready(out)

    ref = _reference(x, weight, gamma, beta, running_mean, running_var)
    assert out.shape == (B, Cout, H // 2, W // 2), out.shape
    # bf16 MXU operands -> loosened tolerance vs the f32 reference
    assert jnp.allclose(out, ref, atol=2e-2, rtol=2e-2), float(jnp.max(jnp.abs(out - ref)))

    print("KERNEL_OK")
</pallas_src>

<mosaic_0001>
module attributes {stable_mosaic.version = 11 : i64} {
  func.func @_conv_bn_silu_kernel(%arg0: i32, %arg1: i32, %arg2: memref<1x16x64xbf16, #tpu.memory_space<vmem>>, %arg3: memref<8x16xbf16, #tpu.memory_space<vmem>>, %arg4: memref<8x1xf32, #tpu.memory_space<vmem>>, %arg5: memref<1x8x64xf32, #tpu.memory_space<vmem>>) attributes {dimension_semantics = [#tpu.dimension_semantics<parallel>, #tpu.dimension_semantics<parallel>], iteration_bounds = array<i64: 2, 1>, scalar_prefetch = 0 : i64, scratch_operands = 0 : i64, tpu.core_type = #tpu.core_type<tc>, window_params = [{transform_indices = @transform_0, window_bounds = array<i64: 1, 16, 64>}, {pipeline_mode = #tpu.pipeline_mode<synchronous>, transform_indices = @transform_1, window_bounds = array<i64: 8, 16>}, {pipeline_mode = #tpu.pipeline_mode<synchronous>, transform_indices = @transform_2, window_bounds = array<i64: 8, 1>}, {transform_indices = @transform_3, window_bounds = array<i64: 1, 8, 64>}]} {
    %c0 = arith.constant 0 : index
    %c0_0 = arith.constant 0 : index
    %0 = vector.load %arg3[%c0, %c0_0] : memref<8x16xbf16, #tpu.memory_space<vmem>>, vector<8x16xbf16>
    %c0_1 = arith.constant 0 : index
    %c0_2 = arith.constant 0 : index
    %c0_3 = arith.constant 0 : index
    %1 = vector.load %arg2[%c0_1, %c0_2, %c0_3] : memref<1x16x64xbf16, #tpu.memory_space<vmem>>, vector<1x16x64xbf16>
    %2 = vector.shape_cast %1 : vector<1x16x64xbf16> to vector<16x64xbf16>
    %cst = arith.constant dense<0.000000e+00> : vector<8x64xf32>
    %3 = tpu.matmul %0, %2, %cst {dimension_numbers = #tpu.dot_dimension_numbers<[1], [0], [0], [1], [0, 0, 1, 1], [], []>} : vector<8x16xbf16>, vector<16x64xbf16>, vector<8x64xf32> -> vector<8x64xf32>
    %c0_4 = arith.constant 0 : index
    %c0_5 = arith.constant 0 : index
    %4 = vector.load %arg4[%c0_4, %c0_5] : memref<8x1xf32, #tpu.memory_space<vmem>>, vector<8x1xf32>
    %5 = vector.broadcast %4 : vector<8x1xf32> to vector<8x64xf32>
    %6 = arith.addf %3, %5 : vector<8x64xf32>
    %cst_6 = arith.constant 0.000000e+00 : f32
    %7 = vector.broadcast %cst_6 : f32 to vector<8x64xf32>
    %8 = arith.subf %7, %6 : vector<8x64xf32>
    %9 = math.exp %8 : vector<8x64xf32>
    %cst_7 = arith.constant 1.000000e+00 : f32
    %10 = vector.broadcast %cst_7 : f32 to vector<8x64xf32>
    %11 = arith.addf %10, %9 : vector<8x64xf32>
    %12 = tpu.reciprocal %11 {approx = true} : vector<8x64xf32> -> vector<8x64xf32>
    %13 = arith.mulf %6, %12 : vector<8x64xf32>
    %c0_8 = arith.constant 0 : index
    %c0_9 = arith.constant 0 : index
    %c0_10 = arith.constant 0 : index
    %14 = vector.load %arg5[%c0_8, %c0_9, %c0_10] : memref<1x8x64xf32, #tpu.memory_space<vmem>>, vector<1x8x64xf32>
    %15 = vector.shape_cast %14 : vector<1x8x64xf32> to vector<8x64xf32>
    %16 = vector.shape_cast %13 : vector<8x64xf32> to vector<1x8x64xf32>
    tpu.vector_store %arg5[%c0_8, %c0_9, %c0_10], %16 {strides = array<i32>} : memref<1x8x64xf32, #tpu.memory_space<vmem>>, vector<1x8x64xf32>,
    return
  }
  func.func @transform_0(%arg0: i32, %arg1: i32) -> (i32, i32, i32) {
    %c0_i32 = arith.constant 0 : i32
    %c0_i32_0 = arith.constant 0 : i32
    return %arg0, %c0_i32, %arg1 : i32, i32, i32
  }
  func.func @transform_1(%arg0: i32, %arg1: i32) -> (i32, i32) {
    %c0_i32 = arith.constant 0 : i32
    %c0_i32_0 = arith.constant 0 : i32
    %c0_i32_1 = arith.constant 0 : i32
    return %c0_i32, %c0_i32_0 : i32, i32
  }
  func.func @transform_2(%arg0: i32, %arg1: i32) -> (i32, i32) {
    %c0_i32 = arith.constant 0 : i32
    %c0_i32_0 = arith.constant 0 : i32
    %c0_i32_1 = arith.constant 0 : i32
    return %c0_i32, %c0_i32_0 : i32, i32
  }
  func.func @transform_3(%arg0: i32, %arg1: i32) -> (i32, i32, i32) {
    %c0_i32 = arith.constant 0 : i32
    %c0_i32_0 = arith.constant 0 : i32
    return %arg0, %c0_i32, %arg1 : i32, i32, i32
  }
}

</mosaic_0001>

<bundles_post_ra>
// kernel: tpu_custom_call.1
= control target key start
LH: loop header
LB: loop body
LE: loop exit
PB: predicated region body
PF: predicated region fallthrough
CT: control target
= control target key end

     0   :  { %8 = vsyncpa [#allocation3], 0  ;;  %s792_s0 = inlined_call_operand.hbm [shape: bf16[2,16,64], index: 0, kind: input, shape index: {}]   ;;  %s793_s1 = inlined_call_operand.vmem [shape: bf16[8,16], index: 1, kind: input, shape index: {}]   ;;  %s794_s2 = inlined_call_operand.vmem [shape: f32[8,1], index: 2, kind: input, shape index: {}]   ;;  %s795_s3 = inlined_call_operand.hbm [shape: f32[2,8,64], index: 3, kind: output, shape index: {}]  }
   0x1   :  { %10 = vsyncpa [#allocation3 + $0x1], 0 }
   0x2   :  { %11 = vsyncpa [#allocation4], 0 }
   0x3   :  { %13 = vsyncpa [#allocation4 + $0x1], 0  ;;  %s609_s12 = smov 0   ;;  %s611_s13 = smov 0  }
   0x4   :  { %s613_s14 = smov 0   ;;  %s615_s15 = smov 0  }
   0x5   :  { %s617_s16 = smov 0   ;;  %s619_s17 = smov 0  }
   0x6 LB: > { %s370_s18 = sadd.s32 4294967295, %s580_s17   ;;  %s371_s19 = sadd.s32 4294967294, %s580_s17   ;;  %s580_s17 = sphi %s619_s17, %s19_s17   ;;  %s576_s16 = sphi %s617_s16, %s810_s16   ;;  %s572_s15 = sphi %s615_s15, %s809_s15   ;;  %s568_s14 = sphi %s613_s14, %s808_s14   ;;  %s564_s13 = sphi %s611_s13, %s807_s13   ;;  %s560_s12 = sphi %s609_s12, %s806_s12  }
   0x7   : > { %s31_s20 = sadd.s32 1, %s576_s16  ;;  %s40_s21 = sadd.s32 1, %s568_s14 }
   0x8   : > { %p33_p0 = scmp.ge.s32.totalorder %s31_s20, 2  ;;  %p47_p1 = scmp.ne.s32.totalorder %s568_s14, %s564_s13 }
   0x9   : > { %p48_p2 = scmp.eq.s32.totalorder %s580_s17, 0  ;;  %p53_p3 = scmp.ne.s32.totalorder %s564_s13, %s560_s12 }
   0xa   : > { %s812_s20 = smov (%p33_p0, %s31_s20), 0  ;;  %p54_p5 = scmp.eq.s32.totalorder %s370_s18, 0 }
   0xb   : > { %p650_p4 = por %p48_p2, %p47_p1  ;;  %s35_s23 = ssub.s32 %s576_s16, %s812_s20 }
   0xc   : > { %p121_p6 = scmp.eq.s32.totalorder %s370_s18, 1  ;;  %p38_p7 = scmp.eq.s32.totalorder %s35_s23, 0 }
   0xd   : > { %p656_p8 = por %p54_p5, %p53_p3  ;;  %p127_p10 = scmp.eq.s32.totalorder %s371_s19, 1 }
   0xe   : > { %p660_p9 = por %p121_p6, %p47_p1  ;;  %p407_p13 = scmp.lt.s32.totalorder %s580_s17, 2 }
   0xf   : > { %s665_s26 = scalar_select %p38_p7, %s568_s14, %s40_s21  }
  0x10   : > { %s799_s25 = scalar_select %p660_p9, 1, 0 }
  0x11   : > { %p667_p11 = por %p127_p10, %p53_p3  ;;  %s153_s28 = sand.u32 1, %s568_s14  }
  0x12   : > { %s374_s29 = sshll.u32 %s153_s28, 3  ;;  %s386_s30 = sshll.u32 %s576_s16, 7 }
  0x13   : > { %s800_s27 = scalar_select %p667_p11, 1, 0 }
  0x14   : > { %s678_s6 = scalar_lea.hbm %s792_s0, %s386_s30  ;;  %s157_s7 = scalar_lea.vmem [#allocation2], %s374_s29 }
  0x15   : > { %s165_s8 = sshll.u32 %s157_s7, 4  ;;  %p684_p0 = pnand %p407_p13, %p650_p4  ;;  %s680_s8 = int_to_ptr.vmem [resolvable:$true] %s165_s8 }
  0x16   : > { %s689_s10 = scalar_lea.sflag [#allocation3], %s153_s28  ;;  %s468_s11 = scalar_lea.hbm %s678_s6, 128 }
  0x17   : > { %p469_p2 = scmp.ne.s32.totalorder %s678_s6, %s468_s11  ;;  %p470_p3 = pneg %p684_p0 }
  0x18   : > { %s473_s21 = scalar_lea.hbm %s792_s0, 256  ;;  %p474_p4 = scmp.lt.u32.totalorder %s678_s6, %s792_s0 }
  0x19   : > { %p471_p5 = pnand %p470_p3, %p469_p2  ;;  %p475_p7 = scmp.lt.u32.totalorder %s473_s21, %s468_s11 }
  0x1a   : > { %p477_p13 = scmp.lt.u32.totalorder %s468_s11, %s678_s6 }
  0x1b   : > { %p472_p6 = pneg %p471_p5  ;;  %p476_p10 = por %p475_p7, %p474_p4 }
  0x1d   : > { %p478_p12 = por %p477_p13, %p476_p10 }
  0x1f   : > { %p479_p1 = pnand %p478_p12, %p472_p6 }
  0x21   : > { %482 = shalt.err (!%p479_p1)
}
  0x22   : > { %s483_s28 = scalar_lea.vmem %s680_s8, 128  ;;  %s582_s29 = smov [#allocation2]  }
  0x23   : > { %p484_p2 = scmp.ne.s32.totalorder %s680_s8, %s483_s28  ;;  %s488_s30 = sshll.u32 %s582_s29, 4  ;;  %s489_s30 = int_to_ptr.vmem [resolvable:$false] %s488_s30 }
  0x24   : > { %s490_s4 = scalar_lea.vmem %s489_s30, 256  ;;  %p491_p9 = scmp.lt.s32.totalorder %s680_s8, %s489_s30 }
  0x25   : > { %p486_p5 = pnand %p484_p2, %p470_p3  ;;  %p492_p4 = scmp.lt.s32.totalorder %s490_s4, %s483_s28 }
  0x27   : > { %p487_p11 = pneg %p486_p5  ;;  %p493_p7 = por %p492_p4, %p491_p9 }
  0x29   : > { %p494_p10 = pnand %p493_p7, %p487_p11 }
  0x2b   : > { %497 = shalt.err (!%p494_p10)
}
  0x2c   : > { %s583_s5 = smov 64   ;;  %s584_s7 = smov 4  }
  0x2d   : > { %402 = dma.hbm_to_vmem [thread:$0]  (!%p684_p0), %s678_s6, 128, %s680_s8, %s689_s10, %s583_s5, %s583_s5, %s584_s7  }
  0x2e   : > { %p173_p12 = scmp.lt.s32.totalorder %s580_s17, 3  ;;  %p802_p1 = scmp.ge.s32.totalorder %s580_s17, 1 }
  0x30   : > { %p174_p3 = pnand %p802_p1, %p173_p12 }
  0x31   : > { %s721_s11 = sand.u32 (!%p174_p3), 1, %s564_s13  }
  0x32   : > { %177 = sbr.rel (%p174_p3) target bundleno = 321 (0x141), region = 32  ;;  %s378_s18 = sshll.u32 (!%p174_p3), %s721_s11, 3 }
  0x33   : > { %s180_s19 = scalar_lea.sflag (!%p174_p3), [#allocation3], %s721_s11  ;;  %s183_s21 = scalar_lea.vmem (!%p174_p3), [#allocation2], %s378_s18 }
  0x39   : > { %551 = dma.done.wait (%p656_p8), %s180_s19, 128  }
  0x3a   : > { %553 = vsyncadd (%p656_p8), %s180_s19, 4294967168  ;;  %v585_v0 = vmov 0.0   ;;  %vm586_vm0 = vmmov 0   ;;  %v587_v1 = vmov 0   ;;  %v463_v2 = vld [vmem:[%s183_s21] sm:$0xff]   ;;  %vm222_vm1 = vcmask 130048  }
  0x3b   : > { %389 = vmatprep.subr.bf16.mxu0 %v585_v0  ;;  %391 = vmatprep.mubr.msk.bf16.mxu0 %vm586_vm0, %v585_v0  ;;  %v210_v3 = vld [vmem:[%s794_s2] sm:$0xff]  ;;  %s383_s24 = sshll.u32 %s572_s15, 7  ;;  %s205_s22 = scalar_lea.vmem [#allocation5], %s378_s18  ;;  %vm272_vm2 = vcmask 523264  }
  0x3c   : > { %462 = vset.pattern.permute.xlu0 %v587_v1  ;;  %390 = vmatpush3.bf16.msra.mxu0 %v463_v2  ;;  %v207_v4 = vld [vmem:[%s793_s1] sm:$0xf]  ;;  %s289_s23 = sshll.u32 %s205_s22, 4  ;;  %s743_s30 = scalar_lea.hbm %s795_s3, %s383_s24  ;;  %s745_s23 = int_to_ptr.vmem [resolvable:$true] %s289_s23 }
  0x3d   : > { %213 = vperm.xlu0 %462, %v210_v3   ;;  %s275_s4 = scalar_lea.sflag [#allocation4], %s721_s11  ;;  %s498_s5 = scalar_lea.vmem %s745_s23, 128 }
  0x3e   : > { %p499_p8 = scmp.ne.s32.totalorder %s745_s23, %s498_s5  ;;  %p803_p9 = scmp.ne.s32.totalorder %s799_s25, 0 }
  0x3f   : > { %392 = vmatmul.mubr.msk.bf16.vlgmr.msra.gmra.mrb[0].mxu0 %vm222_vm1, %v207_v4  ;;  %s588_s15 = smov [#allocation5]  }
  0x40   : > { %p500_p11 = pnand %p499_p8, %p803_p9  ;;  %s502_s7 = sshll.u32 %s588_s15, 4  ;;  %s503_s7 = int_to_ptr.vmem [resolvable:$false] %s502_s7 }
  0x41   : > { %s504_s18 = scalar_lea.vmem %s503_s7, 256  ;;  %p505_p6 = scmp.lt.s32.totalorder %s745_s23, %s503_s7 }
  0x42   : > { %p501_p0 = pneg %p500_p11  ;;  %p506_p13 = scmp.lt.s32.totalorder %s504_s18, %s498_s5 }
  0x44   : > { %p507_p2 = por %p506_p13, %p505_p6 }
  0x46   : > { %p508_p5 = pnand %p507_p2, %p501_p0 }
  0xbc   : > { %v214_v5 = vpop.permute.xlu0 %213 }
 0x112   : > { %v260_v6 = vpop.f32.mrb[0].mxu0 }
 0x113   : > { %v261_v7 = vadd.f32 %v260_v6, %v214_v5  ;;  %v393_v8 = vpop.f32.mrb[1].mxu0 }
 0x114   : > { %v263_v9 = vpop.f32.mrb[2].mxu0 }
 0x115   : > { %v266_v10 = vsub.f32 0.0, %v261_v7  ;;  %v394_v11 = vpop.f32.mrb[3].mxu0 }
 0x117   : > { %v267_v12 = vmul.f32 1.442695, %v266_v10 }
 0x119   : > { %464 = vpow2.f32 %v267_v12 }
 0x123   : > { %v465_v13 = vpop.eup %464 }
 0x124   : > { %v269_v14 = vadd.f32 1.0, %v465_v13 }
 0x126   : > { %466 = vrcp.f32 %v269_v14 }
 0x130   : > { %v467_v15 = vpop.eup %466 }
 0x131   : > { %v271_v16 = vmul.f32 %v467_v15, %v261_v7 }
 0x133   : > { %273 = vst.msk [vmem:[%s205_s22] sm:$0xff] %vm272_vm2, %v271_v16 }
 0x134   : > { %511 = shalt.err (!%p508_p5)
}
 0x135   : > { %s512_s11 = scalar_lea.hbm %s743_s30, 128  ;;  %s516_s6 = scalar_lea.hbm %s795_s3, 256 }
 0x136   : > { %p513_p4 = scmp.ne.s32.totalorder %s743_s30, %s512_s11  ;;  %p517_p12 = scmp.lt.u32.totalorder %s743_s30, %s795_s3 }
 0x137   : > { %p518_p1 = scmp.lt.u32.totalorder %s516_s6, %s512_s11  ;;  %p520_p8 = scmp.lt.u32.totalorder %s512_s11, %s743_s30 }
 0x138   : > { %p514_p7 = pnand %p513_p4, %p803_p9 }
 0x139   : > { %p519_p3 = por %p518_p1, %p517_p12 }
 0x13a   : > { %p515_p10 = pneg %p514_p7 }
 0x13b   : > { %p521_p11 = por %p520_p8, %p519_p3 }
 0x13d   : > { %p522_p0 = pnand %p521_p11, %p515_p10 }
 0x13f   : > { %525 = shalt.err (!%p522_p0)
}
 0x140   : > { %397 = dma.vmem_to_hbm [thread:$0]  (%p803_p9), %s745_s23, 128, %s743_s30, %s275_s4  }
 0x141 PF: > { %s301_s10 = sand.u32 1, %s560_s12   ;;  %p804_p6 = scmp.ne.s32.totalorder %s800_s27, 0 }
 0x142   : > { %p805_p13 = scmp.ge.s32.totalorder %s580_s17, 2  ;;  %s302_s24 = scalar_lea.sflag [#allocation4], %s301_s10 }
 0x144   : > { %p404_p2 = pnand %p805_p13, %p804_p6 }
 0x146   : > { %555 = dma.done.wait (!%p404_p2), %s302_s24, 128  }
 0x147   : > { %557 = vsyncadd (!%p404_p2), %s302_s24, 4294967168  ;;  %s19_s17 = sadd.s32 1, %s580_s17   ;;  %s806_s12 = smov %s564_s13 }
 0x148   : > { %p16_p5 = scmp.ge.s32.totalorder %s19_s17, 4   ;;  %s807_s13 = smov %s568_s14 }
 0x149   : > { %s808_s14 = smov %s665_s26  ;;  %s809_s15 = smov %s576_s16 }
 0x14a   : > { %s810_s16 = smov %s812_s20  ;;  %18 = sbr.rel (!%p16_p5) target bundleno = 6 (0x6), region = 77 }
 0x151   :  { %307 = vsyncpa [#allocation3], 1 }
 0x152   :  { %309 = vsyncpa [#allocation3 + $0x1], 1 }
 0x153   :  { %310 = vsyncpa [#allocation4], 1 }
 0x154   :  { %312 = vsyncpa [#allocation4 + $0x1], 1 }

</bundles_post_ra>
